<compile_context>
chip_gen: v7x
topology: tpu7x:2x2x1
jax: 0.10.0
libtpu: 0.0.40
codegen_flags: <defaults>
</compile_context>

<pallas_src>
import math
from typing import NamedTuple

import jax
import jax.numpy as jnp
from jax.experimental import pallas as pl
from jax.experimental.pallas import tpu as pltpu


DEFAULT_TM = 256        # batch-tile base (sublane axis)
DEFAULT_TN = 512        # output-feature tile base (lane axis)
DEFAULT_TK = 1024       # reduction tile base
VMEM_LIMIT_BYTES = 48 * 1024 * 1024   # default double-buffered footprint ~15 MiB


def _round_up(v, m):
    return ((v + m - 1) // m) * m


def _pick_tile(dim, base, align):
    """Pick (tile, padded_dim).

    dim <= base: use the full extent, no padding (full-extent blocks are
    exempt from the (8,128) divisibility rule).  Otherwise choose the
    smallest align-multiple tile covering dim in ceil(dim/base) blocks, so
    padding hugs the real size instead of rounding up to a whole base tile.
    """
    if dim <= base:
        return dim, dim
    nblocks = -(-dim // base)                       # cdiv
    tile = _round_up(-(-dim // nblocks), align)     # snug; <= base since base % align == 0
    return tile, tile * nblocks


def _pad2d(a, rows, cols):
    r, c = a.shape
    if r == rows and c == cols:
        return a
    return jnp.pad(a, ((0, rows - r), (0, cols - c)))


def _complex_linear_kernel(xr_ref, xi_ref, wr_ref, wi_ref, br_ref, bi_ref,
                           or_ref, oi_ref, acc_r, acc_i):
    """One (tm, tn) output tile of real+imag parts; K is the last
    ('arbitrary') grid axis, accumulated in resident f32 scratch."""
    k = pl.program_id(2)

    xr = xr_ref[...]
    xi = xi_ref[...]
    wr = wr_ref[...]
    wi = wi_ref[...]

    # 2x2 complex product: four MXU matmuls with f32 accumulation.
    pr = (jnp.dot(xr, wr, preferred_element_type=jnp.float32)
          - jnp.dot(xi, wi, preferred_element_type=jnp.float32))
    pi = (jnp.dot(xi, wr, preferred_element_type=jnp.float32)
          + jnp.dot(xr, wi, preferred_element_type=jnp.float32))

    @pl.when(k == 0)
    def _():
        # Fold the pre-combined bias into the accumulator init: no memset pass.
        acc_r[...] = br_ref[...] + pr
        acc_i[...] = bi_ref[...] + pi

    @pl.when(k > 0)
    def _():
        acc_r[...] += pr
        acc_i[...] += pi

    @pl.when(k == pl.num_programs(2) - 1)
    def _():
        or_ref[...] = acc_r[...].astype(or_ref.dtype)
        oi_ref[...] = acc_i[...].astype(oi_ref.dtype)


def _complex_matmul(xr, xi, wr, wi, br, bi, *, tm, tn, tk):
    """All operands already padded to tile multiples.  Returns (yr, yi) f32."""
    Mp, Kp = xr.shape
    _, Np = wr.shape
    grid = (Mp // tm, Np // tn, Kp // tk)

    itemsize = jnp.dtype(xr.dtype).itemsize
    cost = pl.CostEstimate(
        flops=int(8 * Mp * Kp * Np),
        transcendentals=0,
        bytes_accessed=int(itemsize * 2 * (Mp * Kp + Kp * Np)
                           + 4 * 2 * (Np + Mp * Np)),
    )

    out_shape = (jax.ShapeDtypeStruct((Mp, Np), jnp.float32),
                 jax.ShapeDtypeStruct((Mp, Np), jnp.float32))

    return pl.pallas_call(
        _complex_linear_kernel,
        out_shape=out_shape,
        grid_spec=pltpu.PrefetchScalarGridSpec(
            num_scalar_prefetch=0,
            grid=grid,
            in_specs=[
                pl.BlockSpec((tm, tk), lambda i, j, k: (i, k)),   # x real
                pl.BlockSpec((tm, tk), lambda i, j, k: (i, k)),   # x imag
                pl.BlockSpec((tk, tn), lambda i, j, k: (k, j)),   # w_r
                pl.BlockSpec((tk, tn), lambda i, j, k: (k, j)),   # w_i
                pl.BlockSpec((1, tn), lambda i, j, k: (0, j)),    # b_r - b_i
                pl.BlockSpec((1, tn), lambda i, j, k: (0, j)),    # b_r + b_i
            ],
            out_specs=[
                pl.BlockSpec((tm, tn), lambda i, j, k: (i, j)),   # out real
                pl.BlockSpec((tm, tn), lambda i, j, k: (i, j)),   # out imag
            ],
            scratch_shapes=[pltpu.VMEM((tm, tn), jnp.float32),
                            pltpu.VMEM((tm, tn), jnp.float32)],
        ),
        compiler_params=pltpu.CompilerParams(
            dimension_semantics=("parallel", "parallel", "arbitrary"),
            vmem_limit_bytes=VMEM_LIMIT_BYTES,
        ),
        cost_estimate=cost,
    )(xr, xi, wr, wi, br, bi)


class ComplexLinearParams(NamedTuple):
    w_r: jax.Array        # (Kp, Np), compute dtype
    w_i: jax.Array        # (Kp, Np), compute dtype
    b_r_comb: jax.Array   # (1, Np) f32 = b_r - b_i
    b_i_comb: jax.Array   # (1, Np) f32 = b_r + b_i
    in_features: int
    out_features: int
    tn: int
    tk: int
    compute_dtype: object


def prepare_complex_linear(w_r, b_r, w_i, b_i, *,
                           tn_base=DEFAULT_TN, tk_base=DEFAULT_TK,
                           compute_dtype=jnp.float32):
    """One-time parameter preparation, hoisted out of the per-call path."""
    K, N = w_r.shape
    tk, Kp = _pick_tile(K, tk_base, 128)
    tn, Np = _pick_tile(N, tn_base, 128)
    # Guarantee >=2 N tiles when it costs no extra padding, so a
    # single-M-tile (small batch) call still occupies both v7x TensorCores.
    if Np // tn == 1 and Np >= 256 and Np % 256 == 0:
        tn = Np // 2

    wr = _pad2d(w_r.astype(compute_dtype), Kp, Np)
    wi = _pad2d(w_i.astype(compute_dtype), Kp, Np)
    br = _pad2d((b_r - b_i).astype(jnp.float32).reshape(1, N), 1, Np)
    bi = _pad2d((b_r + b_i).astype(jnp.float32).reshape(1, N), 1, Np)
    return ComplexLinearParams(wr, wi, br, bi, K, N, tn, tk, compute_dtype)


def complex_linear_apply(x, params, *, tm_base=DEFAULT_TM):
    """x: (..., in_features) complex64 -> (..., out_features) complex64."""
    orig_shape = x.shape
    if x.ndim != 2:
        x = x.reshape(-1, orig_shape[-1])
    B, K = x.shape
    assert K == params.in_features
    Kp, Np = params.w_r.shape
    N = params.out_features

    tm, Mp = _pick_tile(B, tm_base, 8)

    # TODO(synk): XLA has no complex<->real bitcast, so splitting x into
    # real/imag planes costs one fused pass over the activations; weights,
    # biases and output need no extra wrapper passes.
    xr = _pad2d(jnp.real(x).astype(params.compute_dtype), Mp, Kp)
    xi = _pad2d(jnp.imag(x).astype(params.compute_dtype), Mp, Kp)

    yr, yi = _complex_matmul(xr, xi, params.w_r, params.w_i,
                             params.b_r_comb, params.b_i_comb,
                             tm=tm, tn=params.tn, tk=params.tk)

    if Mp != B or Np != N:
        yr = yr[:B, :N]
        yi = yi[:B, :N]
    out = jax.lax.complex(yr, yi).astype(jnp.complex64)
    if len(orig_shape) != 2:
        out = out.reshape(*orig_shape[:-1], N)
    return out


def complex_linear(x, w_r, b_r, w_i, b_i, *,
                   tm_base=DEFAULT_TM, tn_base=DEFAULT_TN, tk_base=DEFAULT_TK,
                   compute_dtype=jnp.float32):
    """Convenience one-shot API (prepare + apply)."""
    params = prepare_complex_linear(w_r, b_r, w_i, b_i, tn_base=tn_base,
                                    tk_base=tk_base, compute_dtype=compute_dtype)
    return complex_linear_apply(x, params, tm_base=tm_base)


def init_params(key, in_features, out_features):
    """Deterministic init mirroring PyTorch nn.Linear default: U(-1/sqrt(in), 1/sqrt(in))."""
    k1, k2, k3, k4 = jax.random.split(key, 4)
    bound = 1.0 / math.sqrt(in_features)
    # Stored as (in, out) = transpose of PyTorch's (out, in).
    w_r = jax.random.uniform(k1, (in_features, out_features), jnp.float32, -bound, bound)
    b_r = jax.random.uniform(k2, (out_features,), jnp.float32, -bound, bound)
    w_i = jax.random.uniform(k3, (in_features, out_features), jnp.float32, -bound, bound)
    b_i = jax.random.uniform(k4, (out_features,), jnp.float32, -bound, bound)
    return w_r, b_r, w_i, b_i


def _reference(x, w_r, b_r, w_i, b_i):
    xr = jnp.real(x).astype(jnp.float32)
    xi = jnp.imag(x).astype(jnp.float32)
    ref_r = xr @ w_r - xi @ w_i + (b_r - b_i)
    ref_i = xi @ w_r + xr @ w_i + (b_r + b_i)
    return jax.lax.complex(ref_r, ref_i).astype(jnp.complex64)


if __name__ == "__main__":
    key = jax.random.PRNGKey(0)

    # Case 1: small aligned shapes, precompute-then-apply path.
    B, in_f, out_f = 8, 32, 64
    kxr, kxi, kp, key = jax.random.split(key, 4)
    x = jax.lax.complex(
        jax.random.normal(kxr, (B, in_f), jnp.float32),
        jax.random.normal(kxi, (B, in_f), jnp.float32)).astype(jnp.complex64)
    w_r, b_r, w_i, b_i = init_params(kp, in_f, out_f)
    params = prepare_complex_linear(w_r, b_r, w_i, b_i)
    out = jax.block_until_ready(complex_linear_apply(x, params))
    ref = _reference(x, w_r, b_r, w_i, b_i)
    assert out.shape == (B, out_f) and out.dtype == jnp.complex64
    assert jnp.allclose(out, ref, atol=1e-4, rtol=1e-4)

    # Case 2: non-aligned shapes (full-extent blocks, no padding at all).
    B2, in2, out2 = 5, 20, 24
    kxr2, kxi2, kp2, key = jax.random.split(key, 4)
    x2 = jax.lax.complex(
        jax.random.normal(kxr2, (B2, in2), jnp.float32),
        jax.random.normal(kxi2, (B2, in2), jnp.float32)).astype(jnp.complex64)
    w_r2, b_r2, w_i2, b_i2 = init_params(kp2, in2, out2)
    out2_arr = jax.block_until_ready(complex_linear(x2, w_r2, b_r2, w_i2, b_i2))
    ref2 = _reference(x2, w_r2, b_r2, w_i2, b_i2)
    assert out2_arr.shape == (B2, out2) and out2_arr.dtype == jnp.complex64
    assert jnp.allclose(out2_arr, ref2, atol=1e-4, rtol=1e-4)

    # Case 3: force a multi-tile (M, N, K) grid with small tile bases to
    # exercise K-accumulation, snug padding and the N megacore split.
    B3, in3, out3 = 12, 300, 256
    kxr3, kxi3, kp3, key = jax.random.split(key, 4)
    x3 = jax.lax.complex(
        jax.random.normal(kxr3, (B3, in3), jnp.float32),
        jax.random.normal(kxi3, (B3, in3), jnp.float32)).astype(jnp.complex64)
    w_r3, b_r3, w_i3, b_i3 = init_params(kp3, in3, out3)
    out3_arr = jax.block_until_ready(
        complex_linear(x3, w_r3, b_r3, w_i3, b_i3,
                       tm_base=8, tn_base=256, tk_base=128))
    ref3 = _reference(x3, w_r3, b_r3, w_i3, b_i3)
    assert out3_arr.shape == (B3, out3) and out3_arr.dtype == jnp.complex64
    assert jnp.allclose(out3_arr, ref3, atol=1e-4, rtol=1e-4)

    print("KERNEL_OK")
</pallas_src>

<mosaic_0001>
module attributes {stable_mosaic.version = 11 : i64} {
  func.func @_complex_linear_kernel(%arg0: i32, %arg1: i32, %arg2: i32, %arg3: memref<8x32xf32, #tpu.memory_space<vmem>>, %arg4: memref<8x32xf32, #tpu.memory_space<vmem>>, %arg5: memref<32x64xf32, #tpu.memory_space<vmem>>, %arg6: memref<32x64xf32, #tpu.memory_space<vmem>>, %arg7: memref<1x64xf32, #tpu.memory_space<vmem>>, %arg8: memref<1x64xf32, #tpu.memory_space<vmem>>, %arg9: memref<8x64xf32, #tpu.memory_space<vmem>>, %arg10: memref<8x64xf32, #tpu.memory_space<vmem>>, %arg11: memref<8x64xf32, #tpu.memory_space<vmem>>, %arg12: memref<8x64xf32, #tpu.memory_space<vmem>>) attributes {dimension_semantics = [#tpu.dimension_semantics<parallel>, #tpu.dimension_semantics<parallel>, #tpu.dimension_semantics<arbitrary>], iteration_bounds = array<i64: 1, 1, 1>, scalar_prefetch = 0 : i64, scratch_operands = 2 : i64, tpu.core_type = #tpu.core_type<tc>, window_params = [{transform_indices = @transform_0, window_bounds = array<i64: 8, 32>}, {transform_indices = @transform_1, window_bounds = array<i64: 8, 32>}, {transform_indices = @transform_2, window_bounds = array<i64: 32, 64>}, {transform_indices = @transform_3, window_bounds = array<i64: 32, 64>}, {transform_indices = @transform_4, window_bounds = array<i64: 1, 64>}, {transform_indices = @transform_5, window_bounds = array<i64: 1, 64>}, {transform_indices = @transform_6, window_bounds = array<i64: 8, 64>}, {transform_indices = @transform_7, window_bounds = array<i64: 8, 64>}]} {
    %c0 = arith.constant 0 : index
    %c0_0 = arith.constant 0 : index
    %0 = vector.load %arg3[%c0, %c0_0] : memref<8x32xf32, #tpu.memory_space<vmem>>, vector<8x32xf32>
    %c0_1 = arith.constant 0 : index
    %c0_2 = arith.constant 0 : index
    %1 = vector.load %arg4[%c0_1, %c0_2] : memref<8x32xf32, #tpu.memory_space<vmem>>, vector<8x32xf32>
    %c0_3 = arith.constant 0 : index
    %c0_4 = arith.constant 0 : index
    %2 = vector.load %arg5[%c0_3, %c0_4] : memref<32x64xf32, #tpu.memory_space<vmem>>, vector<32x64xf32>
    %c0_5 = arith.constant 0 : index
    %c0_6 = arith.constant 0 : index
    %3 = vector.load %arg6[%c0_5, %c0_6] : memref<32x64xf32, #tpu.memory_space<vmem>>, vector<32x64xf32>
    %cst = arith.constant dense<0.000000e+00> : vector<8x64xf32>
    %4 = tpu.matmul %0, %2, %cst {dimension_numbers = #tpu.dot_dimension_numbers<[1], [0], [0], [1], [0, 0, 1, 1], [], []>} : vector<8x32xf32>, vector<32x64xf32>, vector<8x64xf32> -> vector<8x64xf32>
    %cst_7 = arith.constant dense<0.000000e+00> : vector<8x64xf32>
    %5 = tpu.matmul %1, %3, %cst_7 {dimension_numbers = #tpu.dot_dimension_numbers<[1], [0], [0], [1], [0, 0, 1, 1], [], []>} : vector<8x32xf32>, vector<32x64xf32>, vector<8x64xf32> -> vector<8x64xf32>
    %6 = arith.subf %4, %5 : vector<8x64xf32>
    %cst_8 = arith.constant dense<0.000000e+00> : vector<8x64xf32>
    %7 = tpu.matmul %1, %2, %cst_8 {dimension_numbers = #tpu.dot_dimension_numbers<[1], [0], [0], [1], [0, 0, 1, 1], [], []>} : vector<8x32xf32>, vector<32x64xf32>, vector<8x64xf32> -> vector<8x64xf32>
    %cst_9 = arith.constant dense<0.000000e+00> : vector<8x64xf32>
    %8 = tpu.matmul %0, %3, %cst_9 {dimension_numbers = #tpu.dot_dimension_numbers<[1], [0], [0], [1], [0, 0, 1, 1], [], []>} : vector<8x32xf32>, vector<32x64xf32>, vector<8x64xf32> -> vector<8x64xf32>
    %9 = arith.addf %7, %8 : vector<8x64xf32>
    %c0_i32 = arith.constant 0 : i32
    %10 = arith.cmpi eq, %arg2, %c0_i32 : i32
    %11 = arith.extui %10 : i1 to i32
    %c0_i32_10 = arith.constant 0 : i32
    %12 = arith.cmpi ne, %11, %c0_i32_10 : i32
    scf.if %12 {
      %c0_15 = arith.constant 0 : index
      %c0_16 = arith.constant 0 : index
      %19 = vector.load %arg7[%c0_15, %c0_16] : memref<1x64xf32, #tpu.memory_space<vmem>>, vector<1x64xf32>
      %20 = vector.broadcast %19 : vector<1x64xf32> to vector<8x64xf32>
      %21 = arith.addf %20, %6 : vector<8x64xf32>
      %c0_17 = arith.constant 0 : index
      %c0_18 = arith.constant 0 : index
      %22 = vector.load %arg11[%c0_17, %c0_18] : memref<8x64xf32, #tpu.memory_space<vmem>>, vector<8x64xf32>
      tpu.vector_store %arg11[%c0_17, %c0_18], %21 {strides = array<i32>} : memref<8x64xf32, #tpu.memory_space<vmem>>, vector<8x64xf32>,
      %c0_19 = arith.constant 0 : index
      %c0_20 = arith.constant 0 : index
      %23 = vector.load %arg8[%c0_19, %c0_20] : memref<1x64xf32, #tpu.memory_space<vmem>>, vector<1x64xf32>
      %24 = vector.broadcast %23 : vector<1x64xf32> to vector<8x64xf32>
      %25 = arith.addf %24, %9 : vector<8x64xf32>
      %c0_21 = arith.constant 0 : index
      %c0_22 = arith.constant 0 : index
      %26 = vector.load %arg12[%c0_21, %c0_22] : memref<8x64xf32, #tpu.memory_space<vmem>>, vector<8x64xf32>
      tpu.vector_store %arg12[%c0_21, %c0_22], %25 {strides = array<i32>} : memref<8x64xf32, #tpu.memory_space<vmem>>, vector<8x64xf32>,
    } else {
    }
    %c0_i32_11 = arith.constant 0 : i32
    %13 = arith.cmpi sgt, %arg2, %c0_i32_11 : i32
    %14 = arith.extui %13 : i1 to i32
    %c0_i32_12 = arith.constant 0 : i32
    %15 = arith.cmpi ne, %14, %c0_i32_12 : i32
    scf.if %15 {
      %c0_15 = arith.constant 0 : index
      %c0_16 = arith.constant 0 : index
      %19 = vector.load %arg11[%c0_15, %c0_16] : memref<8x64xf32, #tpu.memory_space<vmem>>, vector<8x64xf32>
      %20 = arith.addf %19, %6 : vector<8x64xf32>
      %c0_17 = arith.constant 0 : index
      %c0_18 = arith.constant 0 : index
      %21 = vector.load %arg11[%c0_17, %c0_18] : memref<8x64xf32, #tpu.memory_space<vmem>>, vector<8x64xf32>
      tpu.vector_store %arg11[%c0_17, %c0_18], %20 {strides = array<i32>} : memref<8x64xf32, #tpu.memory_space<vmem>>, vector<8x64xf32>,
      %c0_19 = arith.constant 0 : index
      %c0_20 = arith.constant 0 : index
      %22 = vector.load %arg12[%c0_19, %c0_20] : memref<8x64xf32, #tpu.memory_space<vmem>>, vector<8x64xf32>
      %23 = arith.addf %22, %9 : vector<8x64xf32>
      %c0_21 = arith.constant 0 : index
      %c0_22 = arith.constant 0 : index
      %24 = vector.load %arg12[%c0_21, %c0_22] : memref<8x64xf32, #tpu.memory_space<vmem>>, vector<8x64xf32>
      tpu.vector_store %arg12[%c0_21, %c0_22], %23 {strides = array<i32>} : memref<8x64xf32, #tpu.memory_space<vmem>>, vector<8x64xf32>,
    } else {
    }
    %c0_i32_13 = arith.constant 0 : i32
    %16 = arith.cmpi eq, %arg2, %c0_i32_13 : i32
    %17 = arith.extui %16 : i1 to i32
    %c0_i32_14 = arith.constant 0 : i32
    %18 = arith.cmpi ne, %17, %c0_i32_14 : i32
    scf.if %18 {
      %c0_15 = arith.constant 0 : index
      %c0_16 = arith.constant 0 : index
      %19 = vector.load %arg11[%c0_15, %c0_16] : memref<8x64xf32, #tpu.memory_space<vmem>>, vector<8x64xf32>
      %c0_17 = arith.constant 0 : index
      %c0_18 = arith.constant 0 : index
      %20 = vector.load %arg9[%c0_17, %c0_18] : memref<8x64xf32, #tpu.memory_space<vmem>>, vector<8x64xf32>
      tpu.vector_store %arg9[%c0_17, %c0_18], %19 {strides = array<i32>} : memref<8x64xf32, #tpu.memory_space<vmem>>, vector<8x64xf32>,
      %c0_19 = arith.constant 0 : index
      %c0_20 = arith.constant 0 : index
      %21 = vector.load %arg12[%c0_19, %c0_20] : memref<8x64xf32, #tpu.memory_space<vmem>>, vector<8x64xf32>
      %c0_21 = arith.constant 0 : index
      %c0_22 = arith.constant 0 : index
      %22 = vector.load %arg10[%c0_21, %c0_22] : memref<8x64xf32, #tpu.memory_space<vmem>>, vector<8x64xf32>
      tpu.vector_store %arg10[%c0_21, %c0_22], %21 {strides = array<i32>} : memref<8x64xf32, #tpu.memory_space<vmem>>, vector<8x64xf32>,
    } else {
    }
    return
  }
  func.func @transform_0(%arg0: i32, %arg1: i32, %arg2: i32) -> (i32, i32) {
    %c0_i32 = arith.constant 0 : i32
    return %arg0, %arg2 : i32, i32
  }
  func.func @transform_1(%arg0: i32, %arg1: i32, %arg2: i32) -> (i32, i32) {
    %c0_i32 = arith.constant 0 : i32
    return %arg0, %arg2 : i32, i32
  }
  func.func @transform_2(%arg0: i32, %arg1: i32, %arg2: i32) -> (i32, i32) {
    %c0_i32 = arith.constant 0 : i32
    return %arg2, %arg1 : i32, i32
  }
  func.func @transform_3(%arg0: i32, %arg1: i32, %arg2: i32) -> (i32, i32) {
    %c0_i32 = arith.constant 0 : i32
    return %arg2, %arg1 : i32, i32
  }
  func.func @transform_4(%arg0: i32, %arg1: i32, %arg2: i32) -> (i32, i32) {
    %c0_i32 = arith.constant 0 : i32
    %c0_i32_0 = arith.constant 0 : i32
    return %c0_i32, %arg1 : i32, i32
  }
  func.func @transform_5(%arg0: i32, %arg1: i32, %arg2: i32) -> (i32, i32) {
    %c0_i32 = arith.constant 0 : i32
    %c0_i32_0 = arith.constant 0 : i32
    return %c0_i32, %arg1 : i32, i32
  }
  func.func @transform_6(%arg0: i32, %arg1: i32, %arg2: i32) -> (i32, i32) {
    %c0_i32 = arith.constant 0 : i32
    return %arg0, %arg1 : i32, i32
  }
  func.func @transform_7(%arg0: i32, %arg1: i32, %arg2: i32) -> (i32, i32) {
    %c0_i32 = arith.constant 0 : i32
    return %arg0, %arg1 : i32, i32
  }
}

</mosaic_0001>

<bundles_post_ra>
// kernel: tpu_custom_call.1
= control target key start
LH: loop header
LB: loop body
LE: loop exit
PB: predicated region body
PF: predicated region fallthrough
CT: control target
= control target key end

     0   :  { %13 = vsyncpa [#allocation5], 0  ;;  %s837_s0 = inlined_call_operand.hbm [shape: f32[8,32], index: 0, kind: input, shape index: {}]   ;;  %s838_s1 = inlined_call_operand.hbm [shape: f32[8,32], index: 1, kind: input, shape index: {}]   ;;  %s839_s2 = inlined_call_operand.hbm [shape: f32[32,64], index: 2, kind: input, shape index: {}]   ;;  %s840_s3 = inlined_call_operand.hbm [shape: f32[32,64], index: 3, kind: input, shape index: {}]   ;;  %s841_s4 = inlined_call_operand.vmem [shape: f32[1,64], index: 4, kind: input, shape index: {}]   ;;  %s842_s5 = inlined_call_operand.vmem [shape: f32[1,64], index: 5, kind: input, shape index: {}]   ;;  %s843_s6 = inlined_call_operand.hbm [shape: f32[8,64], index: 6, kind: output, shape index: {0}]   ;;  %s844_s7 = inlined_call_operand.hbm [shape: f32[8,64], index: 7, kind: output, shape index: {1}]  }
   0x1   :  { %14 = vsyncpa [#allocation8], 0 }
   0x2   :  { %15 = vsyncpa [#allocation11], 0 }
   0x3   :  { %16 = vsyncpa [#allocation6], 0 }
   0x4   :  { %17 = vsyncpa [#allocation14], 0  ;;  %s696_s24 = smov [#allocation7]   ;;  %s697_s26 = smov [#allocation4]  }
   0x5   :  { %s34_s25 = sshll.u32 %s696_s24, 4  ;;  %s24_s27 = sshll.u32 %s697_s26, 4  ;;  %s35_s25 = int_to_ptr.vmem [resolvable:$true] %s34_s25  ;;  %s25_s27 = int_to_ptr.vmem [resolvable:$true] %s24_s27 }
   0x6   :  { %s554_s30 = scalar_lea.hbm %s838_s1, 128 }
   0x7   :  { %p555_p0 = scmp.ne.s32.totalorder %s838_s1, %s554_s30  ;;  %p558_p1 = scmp.lt.u32.totalorder %s554_s30, %s838_s1 }
   0x9   :  { %p560_p2 = pnand %p558_p1, %p555_p0 }
   0xb   :  { %563 = shalt.err (!%p560_p2)
}
   0xc   :  { %s564_s12 = scalar_lea.vmem %s35_s25, 128  ;;  %p569_p4 = scmp.lt.s32.totalorder %s35_s25, %s35_s25 }
   0xd   :  { %p565_p3 = scmp.ne.s32.totalorder %s35_s25, %s564_s12  ;;  %p570_p5 = scmp.lt.s32.totalorder %s564_s12, %s564_s12 }
   0xf   :  { %p571_p6 = por %p570_p5, %p569_p4 }
  0x11   :  { %p572_p7 = pnand %p571_p6, %p565_p3 }
  0x13   :  { %575 = shalt.err (!%p572_p7)
}
  0x14   :  { %37 = dma.hbm_to_vmem [thread:$0]  %s838_s1, 128, %s35_s25, [#allocation8]  }
  0x15   :  { %s576_s17 = scalar_lea.hbm %s837_s0, 128 }
  0x16   :  { %p577_p8 = scmp.ne.s32.totalorder %s837_s0, %s576_s17  ;;  %p580_p9 = scmp.lt.u32.totalorder %s576_s17, %s837_s0 }
  0x18   :  { %p582_p10 = pnand %p580_p9, %p577_p8 }
  0x1a   :  { %585 = shalt.err (!%p582_p10)
}
  0x1b   :  { %s586_s22 = scalar_lea.vmem %s25_s27, 128  ;;  %p591_p12 = scmp.lt.s32.totalorder %s25_s27, %s25_s27 }
  0x1c   :  { %p587_p11 = scmp.ne.s32.totalorder %s25_s27, %s586_s22  ;;  %p592_p13 = scmp.lt.s32.totalorder %s586_s22, %s586_s22 }
  0x1e   :  { %p593_p0 = por %p592_p13, %p591_p12 }
  0x20   :  { %p594_p1 = pnand %p593_p0, %p587_p11 }
  0x22   :  { %597 = shalt.err (!%p594_p1)
}
  0x23   :  { %27 = dma.hbm_to_vmem [thread:$0]  %s837_s0, 128, %s25_s27, [#allocation5]  }
  0x24   :  { %s698_s24 = smov [#allocation9]   ;;  %s598_s29 = scalar_lea.hbm %s839_s2, 512 }
  0x25   :  { %s43_s25 = sshll.u32 %s698_s24, 4  ;;  %p599_p2 = scmp.ne.s32.totalorder %s839_s2, %s598_s29  ;;  %s44_s25 = int_to_ptr.vmem [resolvable:$true] %s43_s25 }
  0x26   :  { %p602_p3 = scmp.lt.u32.totalorder %s598_s29, %s839_s2 }
  0x28   :  { %p604_p4 = pnand %p602_p3, %p599_p2 }
  0x2a   :  { %607 = shalt.err (!%p604_p4)
}
  0x2b   :  { %s608_s11 = scalar_lea.vmem %s44_s25, 512  ;;  %p613_p6 = scmp.lt.s32.totalorder %s44_s25, %s44_s25 }
  0x2c   :  { %p609_p5 = scmp.ne.s32.totalorder %s44_s25, %s608_s11  ;;  %p614_p7 = scmp.lt.s32.totalorder %s608_s11, %s608_s11 }
  0x2e   :  { %p615_p8 = por %p614_p7, %p613_p6 }
  0x30   :  { %p616_p9 = pnand %p615_p8, %p609_p5 }
  0x32   :  { %619 = shalt.err (!%p616_p9)
}
  0x33   :  { %s699_s0 = smov 128   ;;  %s700_s27 = smov 8  }
  0x34   :  { %49 = dma.hbm_to_vmem [thread:$0]  %s839_s2, 512, %s44_s25, [#allocation8], %s699_s0, %s699_s0, %s700_s27  }
  0x35   :  { %s701_s14 = smov [#allocation10]   ;;  %s620_s18 = scalar_lea.hbm %s840_s3, 512 }
  0x36   :  { %s55_s15 = sshll.u32 %s701_s14, 4  ;;  %p621_p10 = scmp.ne.s32.totalorder %s840_s3, %s620_s18  ;;  %s56_s15 = int_to_ptr.vmem [resolvable:$true] %s55_s15 }
  0x37   :  { %p624_p11 = scmp.lt.u32.totalorder %s620_s18, %s840_s3 }
  0x39   :  { %p626_p12 = pnand %p624_p11, %p621_p10 }
  0x3b   :  { %629 = shalt.err (!%p626_p12)
}
  0x3c   :  { %s630_s1 = scalar_lea.vmem %s56_s15, 512  ;;  %p635_p0 = scmp.lt.s32.totalorder %s56_s15, %s56_s15 }
  0x3d   :  { %p631_p13 = scmp.ne.s32.totalorder %s56_s15, %s630_s1  ;;  %p636_p1 = scmp.lt.s32.totalorder %s630_s1, %s630_s1 }
  0x3f   :  { %p637_p2 = por %p636_p1, %p635_p0 }
  0x41   :  { %p638_p3 = pnand %p637_p2, %p631_p13 }
  0x43   :  { %641 = shalt.err (!%p638_p3)
}
  0x44   :  { %61 = dma.hbm_to_vmem [thread:$0]  %s840_s3, 512, %s56_s15, [#allocation11], %s699_s0, %s699_s0, %s700_s27  }
  0x45   :  { %686 = dma.done.wait [#allocation5], 128  }
  0x46   :  { %687 = vsyncadd [#allocation5], 4294967168 }
  0x47   :  { %688 = dma.done.wait [#allocation8], 640  }
  0x48   :  { %689 = vsyncadd [#allocation8], 4294966656 }
  0x49   :  { %690 = dma.done.wait [#allocation11], 512  }
  0x4a   :  { %691 = vsyncadd [#allocation11], 4294966784  ;;  %v702_v0 = vmov 0.0|0.0   ;;  %vm703_vm0 = vmmov 0   ;;  %v704_v1 = vmov 0.0   ;;  %v80_v2 = vld [vmem:[#allocation9] sm:$0xff] }
  0x4b   :  { %519 = vmatprep.subr.bf16.mxu0 %v702_v0  ;;  %525 = vmatprep.subr.bf16.mxu1 %v702_v0  ;;  %v81_v3 = vld [vmem:[#allocation9 + $0x8] sm:$0xff]  ;;  %v84_v4 = vld [vmem:[#allocation10] sm:$0xff]  ;;  %v82_v7 = vld [vmem:[#allocation9 + $0x10] sm:$0xff]  ;;  %vm88_vm1 = vcmask 261120   ;;  %vm388_vm2 = vcmask 523264   ;;  %s705_s28 = smov [#allocation12]  }
  0x4c   :  { %483 = vmatprep.mubr.msk.f32.mxu0 %vm703_vm0, %v704_v1  ;;  %494 = vmatprep.mubr.msk.f32.mxu1 %vm703_vm0, %v704_v1  ;;  %v520_v5 = vpack.c.bf16 %v81_v3, %v80_v2  ;;  %v85_v6 = vld [vmem:[#allocation10 + $0x8] sm:$0xff]  ;;  %v83_v8 = vld [vmem:[#allocation9 + $0x18] sm:$0xff]  ;;  %v86_v10 = vld [vmem:[#allocation10 + $0x10] sm:$0xff]  ;;  %s424_s29 = sshll.u32 %s705_s28, 4  ;;  %s425_s29 = int_to_ptr.vmem [resolvable:$true] %s424_s29 }
  0x4d   :  { %v526_v9 = vpack.c.bf16 %v85_v6, %v84_v4  ;;  %v87_v11 = vld [vmem:[#allocation10 + $0x18] sm:$0xff]  ;;  %v523_v12 = vpack.c.bf16 %v83_v8, %v82_v7  ;;  %v78_v14 = vld [vmem:[#allocation4] sm:$0xff]  ;;  %v453_v18 = vld [vmem:[%s841_s4] ss:$0 sm:$0xff]  ;;  %s642_s4 = scalar_lea.vmem %s425_s29, 128  ;;  %p647_p5 = scmp.lt.s32.totalorder %s425_s29, %s425_s29 }
  0x4e   :  { %521 = vmatpush3.bf16.msra.mxu0 %v520_v5  ;;  %v529_v13 = vpack.c.bf16 %v87_v11, %v86_v10  ;;  %v79_v15 = vld [vmem:[#allocation7] sm:$0xff]  ;;  %v454_v25 = vld [vmem:[%s842_s5] ss:$0 sm:$0xff]  ;;  %p643_p4 = scmp.ne.s32.totalorder %s425_s29, %s642_s4  ;;  %p648_p6 = scmp.lt.s32.totalorder %s642_s4, %s642_s4 }
  0x4f   :  { %527 = vmatpush3.bf16.msra.mxu1 %v526_v9  ;;  %522 = vmatprep.subr.bf16.mxu0 %v702_v0 }
  0x50   :  { %528 = vmatprep.subr.bf16.mxu1 %v702_v0  ;;  %p649_p7 = por %p648_p6, %p647_p5 }
  0x52   :  { %524 = vmatpush3.bf16.msra.mxu0 %v523_v12  ;;  %p650_p8 = pnand %p649_p7, %p643_p4 }
  0x53   :  { %530 = vmatpush3.bf16.msra.mxu1 %v529_v13  ;;  %531 = vmatprep.subr.bf16.mxu0 %v702_v0 }
  0x54   :  { %537 = vmatprep.subr.bf16.mxu1 %v702_v0 }
  0x55   :  { %484 = vmatmul.mubr.msk.f32.vlgmr.msra.gmra.mrb[0].mxu0 %vm88_vm1, %v78_v14 }
  0x56   :  { %495 = vmatmul.mubr.msk.f32.vlgmr.msra.gmra.mrb[0].mxu1 %vm88_vm1, %v79_v15  ;;  %533 = vmatpush3.bf16.msra.mxu0 %v526_v9 }
  0x57   :  { %539 = vmatpush3.bf16.msra.mxu1 %v520_v5  ;;  %534 = vmatprep.subr.bf16.mxu0 %v702_v0 }
  0x58   :  { %540 = vmatprep.subr.bf16.mxu1 %v702_v0  ;;  %505 = vmatprep.mubr.msk.f32.mxu0 %vm703_vm0, %v704_v1 }
  0x59   :  { %516 = vmatprep.mubr.msk.f32.mxu1 %vm703_vm0, %v704_v1 }
  0x5a   :  { %536 = vmatpush3.bf16.msra.mxu0 %v529_v13 }
  0x5b   :  { %542 = vmatpush3.bf16.msra.mxu1 %v523_v12 }
  0x5d   :  { %506 = vmatmul.mubr.msk.f32.vlgmr.msra.gmra.mrb[2].mxu0 %vm88_vm1, %v78_v14 }
  0x5e   :  { %517 = vmatmul.mubr.msk.f32.vlgmr.msra.gmra.mrb[2].mxu1 %vm88_vm1, %v79_v15 }
 0x128   :  { %v158_v16 = vpop.f32.mrb[0].mxu0 }
 0x129   :  { %v231_v17 = vpop.f32.mrb[0].mxu1  ;;  %v485_v19 = vpop.f32.mrb[1].mxu0 }
 0x12a   :  { %v235_v20 = vsub.f32 %v158_v16, %v231_v17  ;;  %v496_v21 = vpop.f32.mrb[1].mxu1 }
 0x12c   :  { %v387_v22 = vadd.f32 %v453_v18, %v235_v20 }
 0x12e   :  { %389 = vst.msk [vmem:[#allocation2] sm:$0xff] %vm388_vm2, %v387_v22 }
 0x130   :  { %v302_v23 = vpop.f32.mrb[2].mxu0 }
 0x131   :  { %v372_v24 = vpop.f32.mrb[2].mxu1  ;;  %v507_v26 = vpop.f32.mrb[3].mxu0 }
 0x132   :  { %v373_v27 = vadd.f32 %v372_v24, %v302_v23  ;;  %v518_v28 = vpop.f32.mrb[3].mxu1 }
 0x134   :  { %v397_v29 = vadd.f32 %v454_v25, %v373_v27 }
 0x135   :  { %v413_v30 = vld [vmem:[#allocation2] sm:$0xff] }
 0x136   :  { %398 = vst.msk [vmem:[#allocation3] sm:$0xff] %vm388_vm2, %v397_v29  ;;  %415 = vst.msk [vmem:[#allocation12] sm:$0xff] %vm388_vm2, %v413_v30 }
 0x137   :  { %653 = shalt.err (!%p650_p8)
}
 0x138   :  { %s654_s8 = scalar_lea.hbm %s843_s6, 128 }
 0x139   :  { %p655_p9 = scmp.ne.s32.totalorder %s843_s6, %s654_s8  ;;  %p658_p10 = scmp.lt.u32.totalorder %s654_s8, %s843_s6 }
 0x13b   :  { %p660_p11 = pnand %p658_p10, %p655_p9 }
 0x13d   :  { %663 = shalt.err (!%p660_p11)
}
 0x13e   :  { %427 = dma.vmem_to_hbm [thread:$0]  %s425_s29, 128, %s843_s6, [#allocation6]   ;;  %v416_v31 = vld [vmem:[#allocation3] sm:$0xff] }
 0x13f   :  { %s706_s13 = smov [#allocation13]   ;;  %417 = vst.msk [vmem:[#allocation13] sm:$0xff] %vm388_vm2, %v416_v31 }
 0x140   :  { %s434_s14 = sshll.u32 %s706_s13, 4  ;;  %s435_s14 = int_to_ptr.vmem [resolvable:$true] %s434_s14 }
 0x141   :  { %s664_s15 = scalar_lea.vmem %s435_s14, 128  ;;  %p669_p13 = scmp.lt.s32.totalorder %s435_s14, %s435_s14 }
 0x142   :  { %p665_p12 = scmp.ne.s32.totalorder %s435_s14, %s664_s15  ;;  %p670_p0 = scmp.lt.s32.totalorder %s664_s15, %s664_s15 }
 0x144   :  { %p671_p1 = por %p670_p0, %p669_p13 }
 0x146   :  { %p672_p2 = pnand %p671_p1, %p665_p12 }
 0x148   :  { %675 = shalt.err (!%p672_p2)
}
 0x149   :  { %s676_s18 = scalar_lea.hbm %s844_s7, 128 }
 0x14a   :  { %p677_p3 = scmp.ne.s32.totalorder %s844_s7, %s676_s18  ;;  %p680_p4 = scmp.lt.u32.totalorder %s676_s18, %s844_s7 }
 0x14c   :  { %p682_p5 = pnand %p680_p4, %p677_p3 }
 0x14e   :  { %685 = shalt.err (!%p682_p5)
}
 0x14f   :  { %437 = dma.vmem_to_hbm [thread:$0]  %s435_s14, 128, %s844_s7, [#allocation14]  }
 0x150   :  { %692 = dma.done.wait [#allocation6], 128  }
 0x151   :  { %693 = vsyncadd [#allocation6], 4294967168 }
 0x152   :  { %694 = dma.done.wait [#allocation14], 128  }
 0x153   :  { %695 = vsyncadd [#allocation14], 4294967168 }
 0x154   :  { %444 = vsyncpa [#allocation5], 1 }
 0x155   :  { %445 = vsyncpa [#allocation8], 1 }
 0x156   :  { %446 = vsyncpa [#allocation11], 1 }
 0x157   :  { %447 = vsyncpa [#allocation6], 1 }
 0x158   :  { %448 = vsyncpa [#allocation14], 1 }

</bundles_post_ra>
